<compile_context>
chip_gen: v7x
topology: tpu7x:2x2x1
jax: 0.10.0
libtpu: 0.0.40
codegen_flags: <defaults>
</compile_context>

<pallas_src>
import jax
import jax.numpy as jnp
from jax.experimental import pallas as pl
from jax.experimental.pallas import tpu as pltpu


def _lossnet_kernel(x_ref, wbd_ref, b12_ref, w3_ref, b3_ref, out_ref):
    # hidden = relu(x @ block_diag(W1_exp, W2_exp) + [b1; b2])     (TB, 2*interm)
    h = jnp.dot(x_ref[...], wbd_ref[...],
                preferred_element_type=jnp.float32) + b12_ref[...]
    h = jnp.maximum(h, 0.0)
    # out = hidden @ W3^T + b3                                     (TB, 1)
    out = jnp.dot(h, w3_ref[...],
                  preferred_element_type=jnp.float32) + b3_ref[...]
    out_ref[...] = out.astype(out_ref.dtype)


def _round_up(x, m):
    return ((x + m - 1) // m) * m


def lossnet_forward(features, params):
    """features: (f1, f2) each (B, C, L) float32. Returns (B, 1) float32."""
    f1, f2 = features
    w1, b1, w2, b2, w3, b3 = (params["w1"], params["b1"], params["w2"],
                              params["b2"], params["w3"], params["b3"])
    B, C1, L1 = f1.shape
    _, C2, L2 = f2.shape
    interm = w1.shape[0]
    D1, D2 = C1 * L1, C2 * L2
    D = D1 + D2                       # fused input width (e.g. 600)
    H = 2 * interm                    # fused hidden width (e.g. 30)

    # --- Host-side (XLA) prep: fold pooling into weights, fuse branches -------
    # W_exp[c*L + l, j] = W[j, c] / L   (so  x_flat @ W_exp == mean(x, -1) @ W.T)
    w1_exp = jnp.repeat(w1.T, L1, axis=0) / float(L1)          # (D1, interm)
    w2_exp = jnp.repeat(w2.T, L2, axis=0) / float(L2)          # (D2, interm)
    wbd = jnp.zeros((D, H), jnp.float32)
    wbd = wbd.at[:D1, :interm].set(w1_exp)
    wbd = wbd.at[D1:, interm:].set(w2_exp)                     # block-diagonal
    b12 = jnp.concatenate([b1, b2]).reshape(1, H)              # (1, H)
    w3_t = w3.T.astype(jnp.float32)                            # (H, 1)
    b3_2d = b3.reshape(1, 1)

    # Lane-dense fused input: (B, D); row-major flatten is free in XLA.
    x = jnp.concatenate([f1.reshape(B, D1), f2.reshape(B, D2)], axis=1)

    # --- Batch tiling (sized to comfortably fit v7x's 32 MiB scoped VMEM) -----
    TB = min(512, _round_up(B, 8))
    B_pad = _round_up(B, TB)
    if B_pad != B:
        x = jnp.pad(x, ((0, B_pad - B), (0, 0)))

    grid = (B_pad // TB,)

    out = pl.pallas_call(
        _lossnet_kernel,
        out_shape=jax.ShapeDtypeStruct((B_pad, 1), jnp.float32),
        grid=grid,
        in_specs=[
            pl.BlockSpec((TB, D), lambda i: (i, 0)),   # fused features, pipelined
            pl.BlockSpec((D, H), lambda i: (0, 0)),    # block-diag weight, resident
            pl.BlockSpec((1, H), lambda i: (0, 0)),    # fused bias
            pl.BlockSpec((H, 1), lambda i: (0, 0)),    # final linear weight
            pl.BlockSpec((1, 1), lambda i: (0, 0)),    # final bias
        ],
        out_specs=pl.BlockSpec((TB, 1), lambda i: (i, 0)),
        compiler_params=pltpu.CompilerParams(
            dimension_semantics=("parallel",)),
    )(x, wbd, b12, w3_t, b3_2d)

    return out[:B]


def lossnet_reference(features, params):
    """Pure-JAX reference matching the PyTorch forward."""
    f1, f2 = features
    g1 = jnp.mean(f1, axis=-1)
    g2 = jnp.mean(f2, axis=-1)
    h1 = jax.nn.relu(g1 @ params["w1"].T + params["b1"])
    h2 = jax.nn.relu(g2 @ params["w2"].T + params["b2"])
    cat = jnp.concatenate([h1, h2], axis=1)
    return cat @ params["w3"].T + params["b3"]


def init_params(key, feature_sizes=(15, 15), num_channels=(20, 20), interm_dim=15):
    ks = jax.random.split(key, 6)
    def lin(kw, kb, fan_in, fan_out):
        bound = 1.0 / jnp.sqrt(fan_in)
        w = jax.random.uniform(kw, (fan_out, fan_in), jnp.float32, -bound, bound)
        b = jax.random.uniform(kb, (fan_out,), jnp.float32, -bound, bound)
        return w, b
    w1, b1 = lin(ks[0], ks[1], num_channels[0], interm_dim)
    w2, b2 = lin(ks[2], ks[3], num_channels[1], interm_dim)
    w3, b3 = lin(ks[4], ks[5], 2 * interm_dim, 1)
    return {"w1": w1, "b1": b1, "w2": w2, "b2": b2, "w3": w3, "b3": b3}


if __name__ == "__main__":
    key = jax.random.PRNGKey(0)
    k_f1, k_f2, k_p = jax.random.split(key, 3)

    B, C, L = 4, 20, 15  # batch, num_channels, feature_size (AvgPool1d kernel = 15)
    f1 = jax.random.normal(k_f1, (B, C, L), jnp.float32)
    f2 = jax.random.normal(k_f2, (B, C, L), jnp.float32)
    params = init_params(k_p)

    out = lossnet_forward((f1, f2), params)
    out = jax.block_until_ready(out)

    ref = lossnet_reference((f1, f2), params)
    assert out.shape == (B, 1), out.shape
    assert jnp.allclose(out, ref, atol=1e-5, rtol=1e-5), (out, ref)
    print("KERNEL_OK")
</pallas_src>

<mosaic_0001>
module attributes {stable_mosaic.version = 11 : i64} {
  func.func @_lossnet_kernel(%arg0: i32, %arg1: memref<8x600xf32, #tpu.memory_space<vmem>>, %arg2: memref<600x30xf32, #tpu.memory_space<vmem>>, %arg3: memref<1x30xf32, #tpu.memory_space<vmem>>, %arg4: memref<30x1xf32, #tpu.memory_space<vmem>>, %arg5: memref<1x1xf32, #tpu.memory_space<vmem>>, %arg6: memref<8x1xf32, #tpu.memory_space<vmem>>) attributes {dimension_semantics = [#tpu.dimension_semantics<parallel>], iteration_bounds = array<i64: 1>, scalar_prefetch = 0 : i64, scratch_operands = 0 : i64, tpu.core_type = #tpu.core_type<tc>, window_params = [{transform_indices = @transform_0, window_bounds = array<i64: 8, 600>}, {pipeline_mode = #tpu.pipeline_mode<synchronous>, transform_indices = @transform_1, window_bounds = array<i64: 600, 30>}, {pipeline_mode = #tpu.pipeline_mode<synchronous>, transform_indices = @transform_2, window_bounds = array<i64: 1, 30>}, {pipeline_mode = #tpu.pipeline_mode<synchronous>, transform_indices = @transform_3, window_bounds = array<i64: 30, 1>}, {pipeline_mode = #tpu.pipeline_mode<synchronous>, transform_indices = @transform_4, window_bounds = array<i64: 1, 1>}, {transform_indices = @transform_5, window_bounds = array<i64: 8, 1>}]} {
    %c0 = arith.constant 0 : index
    %c0_0 = arith.constant 0 : index
    %0 = vector.load %arg1[%c0, %c0_0] : memref<8x600xf32, #tpu.memory_space<vmem>>, vector<8x600xf32>
    %c0_1 = arith.constant 0 : index
    %c0_2 = arith.constant 0 : index
    %1 = vector.load %arg2[%c0_1, %c0_2] : memref<600x30xf32, #tpu.memory_space<vmem>>, vector<600x30xf32>
    %cst = arith.constant dense<0.000000e+00> : vector<8x30xf32>
    %2 = tpu.matmul %0, %1, %cst {dimension_numbers = #tpu.dot_dimension_numbers<[1], [0], [0], [1], [0, 0, 1, 1], [], []>} : vector<8x600xf32>, vector<600x30xf32>, vector<8x30xf32> -> vector<8x30xf32>
    %c0_3 = arith.constant 0 : index
    %c0_4 = arith.constant 0 : index
    %3 = vector.load %arg3[%c0_3, %c0_4] : memref<1x30xf32, #tpu.memory_space<vmem>>, vector<1x30xf32>
    %4 = vector.broadcast %3 : vector<1x30xf32> to vector<8x30xf32>
    %5 = arith.addf %2, %4 : vector<8x30xf32>
    %cst_5 = arith.constant 0.000000e+00 : f32
    %6 = vector.broadcast %cst_5 : f32 to vector<8x30xf32>
    %7 = arith.maximumf %5, %6 : vector<8x30xf32>
    %c0_6 = arith.constant 0 : index
    %c0_7 = arith.constant 0 : index
    %8 = vector.load %arg4[%c0_6, %c0_7] : memref<30x1xf32, #tpu.memory_space<vmem>>, vector<30x1xf32>
    %cst_8 = arith.constant dense<0.000000e+00> : vector<8x1xf32>
    %9 = tpu.matmul %7, %8, %cst_8 {dimension_numbers = #tpu.dot_dimension_numbers<[1], [0], [0], [1], [0, 0, 1, 1], [], []>} : vector<8x30xf32>, vector<30x1xf32>, vector<8x1xf32> -> vector<8x1xf32>
    %c0_9 = arith.constant 0 : index
    %c0_10 = arith.constant 0 : index
    %10 = vector.load %arg5[%c0_9, %c0_10] : memref<1x1xf32, #tpu.memory_space<vmem>>, vector<1x1xf32>
    %11 = vector.broadcast %10 : vector<1x1xf32> to vector<8x1xf32>
    %12 = arith.addf %9, %11 : vector<8x1xf32>
    %c0_11 = arith.constant 0 : index
    %c0_12 = arith.constant 0 : index
    %13 = vector.load %arg6[%c0_11, %c0_12] : memref<8x1xf32, #tpu.memory_space<vmem>>, vector<8x1xf32>
    tpu.vector_store %arg6[%c0_11, %c0_12], %12 {strides = array<i32>} : memref<8x1xf32, #tpu.memory_space<vmem>>, vector<8x1xf32>,
    return
  }
  func.func @transform_0(%arg0: i32) -> (i32, i32) {
    %c0_i32 = arith.constant 0 : i32
    %c0_i32_0 = arith.constant 0 : i32
    return %arg0, %c0_i32 : i32, i32
  }
  func.func @transform_1(%arg0: i32) -> (i32, i32) {
    %c0_i32 = arith.constant 0 : i32
    %c0_i32_0 = arith.constant 0 : i32
    %c0_i32_1 = arith.constant 0 : i32
    return %c0_i32, %c0_i32_0 : i32, i32
  }
  func.func @transform_2(%arg0: i32) -> (i32, i32) {
    %c0_i32 = arith.constant 0 : i32
    %c0_i32_0 = arith.constant 0 : i32
    %c0_i32_1 = arith.constant 0 : i32
    return %c0_i32, %c0_i32_0 : i32, i32
  }
  func.func @transform_3(%arg0: i32) -> (i32, i32) {
    %c0_i32 = arith.constant 0 : i32
    %c0_i32_0 = arith.constant 0 : i32
    %c0_i32_1 = arith.constant 0 : i32
    return %c0_i32, %c0_i32_0 : i32, i32
  }
  func.func @transform_4(%arg0: i32) -> (i32, i32) {
    %c0_i32 = arith.constant 0 : i32
    %c0_i32_0 = arith.constant 0 : i32
    %c0_i32_1 = arith.constant 0 : i32
    return %c0_i32, %c0_i32_0 : i32, i32
  }
  func.func @transform_5(%arg0: i32) -> (i32, i32) {
    %c0_i32 = arith.constant 0 : i32
    %c0_i32_0 = arith.constant 0 : i32
    return %arg0, %c0_i32 : i32, i32
  }
}

</mosaic_0001>

<bundles_post_ra>
// kernel: tpu_custom_call.1
= control target key start
LH: loop header
LB: loop body
LE: loop exit
PB: predicated region body
PF: predicated region fallthrough
CT: control target
= control target key end

     0   :  { %vm638_vm0 = vmmov 0   ;;  %vm109_vm1 = vcmask 719872   ;;  %vm339_vm2 = vcmask 1045504   ;;  %vm640_vm3 = vmmov 1   ;;  %s932_s1 = inlined_call_operand.vmem [shape: f32[600,30], index: 1, kind: input, shape index: {}]   ;;  %s933_s0 = inlined_call_operand.vmem [shape: f32[8,600], index: 0, kind: input, shape index: {}]   ;;  %s934_s3 = inlined_call_operand.vmem [shape: f32[30,1], index: 3, kind: input, shape index: {}]   ;;  %s935_s4 = inlined_call_operand.<no memory space> [shape: f32[1,1], index: 4, kind: input, shape index: {}]   ;;  %s936_s2 = inlined_call_operand.vmem [shape: f32[1,30], index: 2, kind: input, shape index: {}]   ;;  %s937_s5 = inlined_call_operand.vmem [shape: f32[8,1], index: 5, kind: output, shape index: {}]  }
   0x1   :  { %v43_v0 = vld [vmem:[%s932_s1 + $0x80] sm:$0xff]  ;;  %v44_v1 = vld [vmem:[%s932_s1 + $0x88] sm:$0xff]  ;;  %v45_v11 = vld [vmem:[%s932_s1 + $0x90] sm:$0xff]  ;;  %vm335_vm5 = vcmask 244736   ;;  %vm413_vm6 = vcmask 7168  }
   0x2   :  { %v27_v2 = vld [vmem:[%s932_s1] sm:$0xff]  ;;  %v547_v3 = vpack.c.bf16 %v44_v1, %v43_v0  ;;  %v28_v4 = vld [vmem:[%s932_s1 + $0x8] sm:$0xff]  ;;  %v46_v13 = vld [vmem:[%s932_s1 + $0x98] sm:$0xff] }
   0x3   :  { %v75_v5 = vld [vmem:[%s932_s1 + $0x180] sm:$0xff]  ;;  %v76_v6 = vld [vmem:[%s932_s1 + $0x188] sm:$0xff]  ;;  %v549_v7 = vpack.c.bf16 %v28_v4, %v27_v2  ;;  %v29_v14 = vld [vmem:[%s932_s1 + $0x10] sm:$0xff]  ;;  %v551_v16 = vpack.c.bf16 %v46_v13, %v45_v11 }
   0x4   :  { %v579_v8 = vpack.c.bf16 %v76_v6, %v75_v5  ;;  %v59_v9 = vld [vmem:[%s932_s1 + $0x100] sm:$0xff]  ;;  %v60_v10 = vld [vmem:[%s932_s1 + $0x108] sm:$0xff]  ;;  %548 = vmatprep.subr.bf16.mxu0 %v547_v3  ;;  %v30_v15 = vld [vmem:[%s932_s1 + $0x18] sm:$0xff] }
   0x5   :  { %v581_v12 = vpack.c.bf16 %v60_v10, %v59_v9  ;;  %550 = vmatpush3.bf16.msra.mxu0 %v549_v7  ;;  %v553_v17 = vpack.c.bf16 %v30_v15, %v29_v14  ;;  %v77_v18 = vld [vmem:[%s932_s1 + $0x190] sm:$0xff]  ;;  %v78_v19 = vld [vmem:[%s932_s1 + $0x198] sm:$0xff]  ;;  %v47_v23 = vld [vmem:[%s932_s1 + $0xa0] sm:$0xff] }
   0x6   :  { %580 = vmatprep.subr.bf16.mxu1 %v579_v8  ;;  %v61_v20 = vld [vmem:[%s932_s1 + $0x110] sm:$0xff]  ;;  %v583_v21 = vpack.c.bf16 %v78_v19, %v77_v18  ;;  %v62_v22 = vld [vmem:[%s932_s1 + $0x118] sm:$0xff]  ;;  %v48_v24 = vld [vmem:[%s932_s1 + $0xa8] sm:$0xff]  ;;  %552 = vmatprep.subr.bf16.mxu0 %v551_v16 }
   0x7   :  { %582 = vmatpush3.bf16.msra.mxu1 %v581_v12  ;;  %v585_v25 = vpack.c.bf16 %v62_v22, %v61_v20  ;;  %v555_v26 = vpack.c.bf16 %v48_v24, %v47_v23  ;;  %v31_v27 = vld [vmem:[%s932_s1 + $0x20] sm:$0xff]  ;;  %v32_v28 = vld [vmem:[%s932_s1 + $0x28] sm:$0xff]  ;;  %v49_v35 = vld [vmem:[%s932_s1 + $0xb0] sm:$0xff] }
   0x8   :  { %v79_v29 = vld [vmem:[%s932_s1 + $0x1a0] sm:$0xff]  ;;  %584 = vmatprep.subr.bf16.mxu1 %v583_v21  ;;  %v80_v30 = vld [vmem:[%s932_s1 + $0x1a8] sm:$0xff]  ;;  %v557_v33 = vpack.c.bf16 %v32_v28, %v31_v27  ;;  %v50_v36 = vld [vmem:[%s932_s1 + $0xb8] sm:$0xff] }
   0x9   :  { %v63_v31 = vld [vmem:[%s932_s1 + $0x120] sm:$0xff]  ;;  %v64_v32 = vld [vmem:[%s932_s1 + $0x128] sm:$0xff]  ;;  %554 = vmatpush3.bf16.msra.mxu0 %v553_v17  ;;  %v587_v34 = vpack.c.bf16 %v80_v30, %v79_v29  ;;  %v33_v37 = vld [vmem:[%s932_s1 + $0x30] sm:$0xff]  ;;  %v559_v39 = vpack.c.bf16 %v50_v36, %v49_v35 }
   0xa   :  { %556 = vmatprep.subr.bf16.mxu0 %v555_v26  ;;  %v589_v38 = vpack.c.bf16 %v64_v32, %v63_v31  ;;  %v34_v40 = vld [vmem:[%s932_s1 + $0x38] sm:$0xff]  ;;  %v81_v41 = vld [vmem:[%s932_s1 + $0x1b0] sm:$0xff]  ;;  %v51_v46 = vld [vmem:[%s932_s1 + $0xc0] sm:$0xff] }
   0xb   :  { %586 = vmatpush3.bf16.msra.mxu1 %v585_v25  ;;  %v82_v42 = vld [vmem:[%s932_s1 + $0x1b8] sm:$0xff]  ;;  %v65_v44 = vld [vmem:[%s932_s1 + $0x130] sm:$0xff]  ;;  %v52_v47 = vld [vmem:[%s932_s1 + $0xc8] sm:$0xff]  ;;  %v561_v48 = vpack.c.bf16 %v34_v40, %v33_v37 }
   0xc   :  { %588 = vmatprep.subr.bf16.mxu1 %v587_v34  ;;  %v591_v43 = vpack.c.bf16 %v82_v42, %v81_v41  ;;  %v66_v45 = vld [vmem:[%s932_s1 + $0x138] sm:$0xff]  ;;  %v83_v49 = vld [vmem:[%s932_s1 + $0x1c0] sm:$0xff]  ;;  %v84_v50 = vld [vmem:[%s932_s1 + $0x1c8] sm:$0xff]  ;;  %v563_v52 = vpack.c.bf16 %v52_v47, %v51_v46 }
   0xd   :  { %558 = vmatpush3.bf16.msra.mxu0 %v557_v33  ;;  %v593_v51 = vpack.c.bf16 %v66_v45, %v65_v44  ;;  %v35_v53 = vld [vmem:[%s932_s1 + $0x40] sm:$0xff]  ;;  %v36_v54 = vld [vmem:[%s932_s1 + $0x48] sm:$0xff]  ;;  %v595_v56 = vpack.c.bf16 %v84_v50, %v83_v49  ;;  %v53_v58 = vld [vmem:[%s932_s1 + $0xd0] sm:$0xff]  ;;  %v639_v45 = vmov 0.0  }
   0xe   :  { %560 = vmatprep.subr.bf16.mxu0 %v559_v39  ;;  %v67_v55 = vld [vmem:[%s932_s1 + $0x140] sm:$0xff]  ;;  %v68_v57 = vld [vmem:[%s932_s1 + $0x148] sm:$0xff]  ;;  %v54_v59 = vld [vmem:[%s932_s1 + $0xd8] sm:$0xff]  ;;  %v565_v62 = vpack.c.bf16 %v36_v54, %v35_v53 }
   0xf   :  { %590 = vmatpush3.bf16.msra.mxu1 %v589_v38  ;;  %v85_v60 = vld [vmem:[%s932_s1 + $0x1d0] sm:$0xff]  ;;  %v86_v61 = vld [vmem:[%s932_s1 + $0x1d8] sm:$0xff]  ;;  %v597_v63 = vpack.c.bf16 %v68_v57, %v67_v55  ;;  %v567_v0 = vpack.c.bf16 %v54_v59, %v53_v58  ;;  %v55_v6 = vld [vmem:[%s932_s1 + $0xe0] sm:$0xff]  ;;  %v637_v38 = vmov 0.0|0.0  }
  0x10   :  { %592 = vmatprep.subr.bf16.mxu1 %v591_v43  ;;  %v37_v1 = vld [vmem:[%s932_s1 + $0x50] sm:$0xff]  ;;  %v38_v2 = vld [vmem:[%s932_s1 + $0x58] sm:$0xff]  ;;  %v599_v4 = vpack.c.bf16 %v86_v61, %v85_v60  ;;  %v56_v7 = vld [vmem:[%s932_s1 + $0xe8] sm:$0xff]  ;;  %v10_v61 = vstv %s935_s4 }
  0x11   :  { %562 = vmatpush3.bf16.msra.mxu0 %v561_v48  ;;  %v69_v3 = vld [vmem:[%s932_s1 + $0x150] sm:$0xff]  ;;  %v70_v5 = vld [vmem:[%s932_s1 + $0x158] sm:$0xff]  ;;  %v87_v8 = vld [vmem:[%s932_s1 + $0x1e0] sm:$0xff]  ;;  %v569_v10 = vpack.c.bf16 %v38_v2, %v37_v1  ;;  %v571_v14 = vpack.c.bf16 %v56_v7, %v55_v6  ;;  %11 = vst [vmem:[#allocation2] sm:$0x1] %v10_v61 }
  0x12   :  { %564 = vmatprep.subr.bf16.mxu0 %v563_v52  ;;  %v88_v9 = vld [vmem:[%s932_s1 + $0x1e8] sm:$0xff]  ;;  %v39_v11 = vld [vmem:[%s932_s1 + $0x60] sm:$0xff]  ;;  %v601_v13 = vpack.c.bf16 %v70_v5, %v69_v3  ;;  %v57_v19 = vld [vmem:[%s932_s1 + $0xf0] sm:$0xff] }
  0x13   :  { %594 = vmatpush3.bf16.msra.mxu1 %v593_v51  ;;  %v23_v12 = vld [vmem:[%s933_s0 + $0x8] sm:$0xff]  ;;  %v71_v16 = vld [vmem:[%s932_s1 + $0x160] sm:$0xff]  ;;  %v603_v18 = vpack.c.bf16 %v88_v9, %v87_v8  ;;  %v58_v20 = vld [vmem:[%s932_s1 + $0xf8] sm:$0xff] }
  0x14   :  { %596 = vmatprep.subr.bf16.mxu1 %v595_v56  ;;  %v40_v15 = vld [vmem:[%s932_s1 + $0x68] sm:$0xff]  ;;  %177 = vmatprep.mubr.f32.mxu0 %v23_v12  ;;  %v25_v21 = vld [vmem:[%s933_s0 + $0x18] sm:$0xff]  ;;  %v89_v22 = vld [vmem:[%s932_s1 + $0x1f0] sm:$0xff]  ;;  %v575_v26 = vpack.c.bf16 %v58_v20, %v57_v19 }
  0x15   :  { %566 = vmatpush3.bf16.msra.mxu0 %v565_v62  ;;  %v72_v17 = vld [vmem:[%s932_s1 + $0x168] sm:$0xff]  ;;  %v90_v23 = vld [vmem:[%s932_s1 + $0x1f8] sm:$0xff]  ;;  %247 = vmatprep.mubr.f32.mxu1 %v25_v21  ;;  %v573_v24 = vpack.c.bf16 %v40_v15, %v39_v11  ;;  %v41_v27 = vld [vmem:[%s932_s1 + $0x70] sm:$0xff] }
  0x16   :  { %568 = vmatprep.subr.bf16.mxu0 %v567_v0  ;;  %v605_v25 = vpack.c.bf16 %v72_v17, %v71_v16  ;;  %v42_v28 = vld [vmem:[%s932_s1 + $0x78] sm:$0xff]  ;;  %v607_v29 = vpack.c.bf16 %v90_v23, %v89_v22  ;;  %v73_v30 = vld [vmem:[%s932_s1 + $0x170] sm:$0xff]  ;;  %v91_v34 = vld [vmem:[%s932_s1 + $0x200] sm:$0xff] }
  0x17   :  { %598 = vmatpush3.bf16.msra.mxu1 %v597_v63  ;;  %v74_v31 = vld [vmem:[%s932_s1 + $0x178] sm:$0xff]  ;;  %v577_v32 = vpack.c.bf16 %v42_v28, %v41_v27  ;;  %v92_v35 = vld [vmem:[%s932_s1 + $0x208] sm:$0xff]  ;;  %v22_v36 = vld [vmem:[%s933_s0] sm:$0xff] }
  0x18   :  { %600 = vmatprep.subr.bf16.mxu1 %v599_v4  ;;  %v609_v33 = vpack.c.bf16 %v74_v31, %v73_v30  ;;  %v612_v37 = vpack.c.bf16 %v92_v35, %v91_v34  ;;  %v24_v39 = vld [vmem:[%s933_s0 + $0x10] sm:$0xff]  ;;  %v94_v41 = vld [vmem:[%s932_s1 + $0x218] sm:$0xff]  ;;  %v95_v43 = vld [vmem:[%s932_s1 + $0x220] sm:$0xff] }
  0x19   :  { %570 = vmatpush3.bf16.msra.mxu0 %v569_v10  ;;  %v93_v40 = vld [vmem:[%s932_s1 + $0x210] sm:$0xff]  ;;  %v96_v44 = vld [vmem:[%s932_s1 + $0x228] sm:$0xff]  ;;  %v98_v48 = vld [vmem:[%s932_s1 + $0x238] sm:$0xff] }
  0x1a   :  { %572 = vmatprep.subr.bf16.mxu0 %v571_v14  ;;  %v615_v42 = vpack.c.bf16 %v94_v41, %v93_v40  ;;  %v618_v46 = vpack.c.bf16 %v96_v44, %v95_v43  ;;  %v97_v47 = vld [vmem:[%s932_s1 + $0x230] sm:$0xff]  ;;  %v99_v50 = vld [vmem:[%s932_s1 + $0x240] sm:$0xff]  ;;  %v100_v51 = vld [vmem:[%s932_s1 + $0x248] sm:$0xff] }
  0x1b   :  { %602 = vmatpush3.bf16.msra.mxu1 %v601_v13  ;;  %v621_v49 = vpack.c.bf16 %v98_v48, %v97_v47  ;;  %v624_v52 = vpack.c.bf16 %v100_v51, %v99_v50  ;;  %v101_v53 = vld [vmem:[%s932_s1 + $0x250] sm:$0xff]  ;;  %v26_v54 = vld [vmem:[%s933_s0 + $0x20] sm:$0xff]  ;;  %v325_v56 = vld [vmem:[%s934_s3 + $0x8] sm:$0xff] }
  0x1c   :  { %604 = vmatprep.subr.bf16.mxu1 %v603_v18  ;;  %v324_v55 = vld [vmem:[%s934_s3] sm:$0xff]  ;;  %v326_v58 = vld [vmem:[%s934_s3 + $0x10] sm:$0xff]  ;;  %v327_v59 = vld [vmem:[%s934_s3 + $0x18] sm:$0x3f] }
  0x1d   :  { %574 = vmatpush3.bf16.msra.mxu0 %v573_v24  ;;  %v627_v57 = vpack.c.bf16 %v325_v56, %v324_v55  ;;  %v630_v60 = vpack.c.bf16 %v327_v59, %v326_v58  ;;  %vm631_vm4 = vmpackc.low %vm339_vm2, %vm640_vm3  ;;  %v419_v63 = vld [vmem:[%s936_s2] ss:$0 sm:$0xff] }
  0x1e   :  { %576 = vmatprep.subr.bf16.mxu0 %v575_v26  ;;  %v421_v11 = vld [vmem:[#allocation2] ss:$0 sm:$0xff] }
  0x1f   :  { %606 = vmatpush3.bf16.msra.mxu1 %v605_v25 }
  0x20   :  { %608 = vmatprep.subr.bf16.mxu1 %v607_v29 }
  0x21   :  { %578 = vmatpush3.bf16.msra.mxu0 %v577_v32 }
  0x22   :  { %611 = vmatprep.subr.bf16.mxu0 %v637_v38 }
  0x23   :  { %610 = vmatpush3.bf16.msra.mxu1 %v609_v33 }
  0x24   :  { %626 = vmatprep.subr.bf16.mxu1 %v637_v38  ;;  %178 = vmatmul.mubr.f32.vlgmr.msra.gmra.mrb[0].mxu0 %v22_v36 }
  0x25   :  { %613 = vmatpush3.bf16.msra.mxu0 %v612_v37  ;;  %533 = vmatprep.mubr.msk.f32.mxu0 %vm638_vm0, %v639_v45 }
  0x26   :  { %248 = vmatmul.mubr.f32.vlgmr.msra.gmra.mrb[0].mxu1 %v24_v39  ;;  %614 = vmatprep.subr.bf16.mxu0 %v637_v38 }
  0x27   :  { %544 = vmatprep.mubr.msk.f32.mxu1 %vm638_vm0, %v639_v45  ;;  %628 = vmatpush3.bf16.msra.mxu1 %v627_v57 }
  0x28   :  { %629 = vmatprep.subr.bf16.mxu1 %v637_v38 }
  0x29   :  { %616 = vmatpush3.bf16.msra.mxu0 %v615_v42 }
  0x2a   :  { %617 = vmatprep.subr.bf16.mxu0 %v637_v38 }
  0x2b   :  { %632 = vmatpush3.bf16.msk.msra.mxu1 %vm631_vm4, %v630_v60 }
  0x2d   :  { %619 = vmatpush3.bf16.msra.mxu0 %v618_v46 }
  0x2e   :  { %620 = vmatprep.subr.bf16.mxu0 %v637_v38 }
  0x31   :  { %622 = vmatpush3.bf16.msra.mxu0 %v621_v49 }
  0x32   :  { %623 = vmatprep.subr.bf16.mxu0 %v637_v38 }
  0x35   :  { %625 = vmatpush3.bf16.msra.mxu0 %v624_v52 }
  0x36   :  { %531 = vmatprep.subr.mxu0 %v639_v45 }
  0x39   :  { %532 = vmatpush3.msra.mxu0 %v101_v53 }
  0x3a   :  { %534 = vmatmul.mubr.msk.f32.vlgmr.msra.gmra.mrb[2].mxu0 %vm109_vm1, %v26_v54 }
  0xf7   :  { %v456_v62 = vpop.f32.mrb[0].mxu0 }
  0xf8   :  { %v457_v0 = vpop.f32.mrb[1].mxu0 }
  0xf9   :  { %v491_v1 = vpop.f32.mrb[0].mxu1  ;;  %v458_v2 = vadd.f32 %v457_v0, %v456_v62 }
  0xfa   :  { %v492_v3 = vpop.f32.mrb[1].mxu1 }
  0xfb   :  { %v493_v4 = vadd.f32 %v492_v3, %v491_v1  ;;  %v180_v5 = vadd.f32 %v458_v2, %v419_v63 }
  0xfd   :  { %v250_v6 = vadd.f32 %v493_v4, %v180_v5 }
 0x10d   :  { %v319_v7 = vpop.f32.mrb[2].mxu0 }
 0x10e   :  { %v320_v8 = vadd.f32 %v319_v7, %v250_v6  ;;  %v535_v9 = vpop.f32.mrb[3].mxu0 }
 0x110   :  { %v323_v10 = vmax.f32 %v320_v8, 0.0 }
 0x112   :  { %545 = vmatmul.mubr.msk.f32.vlgmr.msra.gmra.mrb[2].mxu1 %vm335_vm5, %v323_v10 }
 0x1e5   :  { %v409_v12 = vpop.f32.mrb[2].mxu1 }
 0x1e6   :  { %v410_v13 = vadd.f32 %v421_v11, %v409_v12  ;;  %v546_v14 = vpop.f32.mrb[3].mxu1 }
 0x1e8   :  { %414 = vst.msk [vmem:[%s937_s5] sm:$0xff] %vm413_vm6, %v410_v13 }

</bundles_post_ra>
